<compile_context>
chip_gen: v7x
topology: tpu7x:2x2x1
jax: 0.10.0
libtpu: 0.0.40
codegen_flags: <defaults>
</compile_context>

<pallas_src>
import jax
import jax.numpy as jnp
from jax.experimental import pallas as pl
from jax.experimental.pallas import tpu as pltpu

# ---- dimensions implied by the module -------------------------------------
D_EHR = 32        # ehr_model.feats_dim == lstm_in  (projection output dim)
D_CXR = 64        # cxr_model.feats_dim == lstm_out == LSTM hidden size
N_CLS = 4         # target_classes
OUT_PAD = 128     # lane-dense padded classifier width
D_IN = D_EHR + D_CXR   # 96 : concatenated [ehr | cxr] kernel input


def _round_up(n, m):
    return ((n + m - 1) // m) * m


# ---------------------------------------------------------------------------
# Pallas kernel: merged input matmul -> 2-step LSTM -> padded Linear + Sigmoid
# ---------------------------------------------------------------------------
def _medfuse_fusion_kernel(feats_ref, w_in_ref, b_in_ref, whh_ref,
                           wc_ref, bc_ref, out_ref):
    H = whh_ref.shape[0]                     # LSTM hidden size (= D_CXR)
    tb = feats_ref.shape[0]

    feats = feats_ref[...]                   # (TB, 96) = [ehr | cxr]

    # One merged MXU call covers both timesteps' input-side gate matmuls
    # (block-diagonal weight [[W_ih, 0], [0, W_proj @ W_ih]]).
    gates_all = jnp.dot(feats, w_in_ref[...],
                        preferred_element_type=jnp.float32)
    gates_all = gates_all + b_in_ref[...].astype(jnp.float32)    # (TB, 8H)

    lane = jax.lax.broadcasted_iota(jnp.int32, (tb, 2 * H), 1)
    first_half = lane < H

    def gate_halves(pre4h):
        """Pre-activations (TB, 4H) in permuted order [i, g, f, o] ->
        (sigmoid(i)*tanh(g), sigmoid(f), sigmoid(o)), each (TB, H)."""
        x_ig = pre4h[:, : 2 * H]             # 128-lane aligned slice
        x_fo = pre4h[:, 2 * H:]              # 128-lane aligned slice
        # Full-width EUP nonlinearities + lane-mask select (VPU).
        act_ig = jnp.where(first_half, jax.nn.sigmoid(x_ig), jnp.tanh(x_ig))
        act_fo = jax.nn.sigmoid(x_fo)
        # Pair gates via XLU roll instead of unaligned 64-lane slices.
        ig = (act_ig * pltpu.roll(act_ig, H, axis=1))[:, :H]
        f = act_fo[:, :H]
        o = pltpu.roll(act_fo, H, axis=1)[:, :H]
        return ig, f, o

    # ---- t = 0 (EHR features): h0 = c0 = 0 -> no h@W_hh, no forget term ----
    ig0, _, o0 = gate_halves(gates_all[:, : 4 * H])
    c1 = ig0
    h1 = o0 * jnp.tanh(c1)

    # ---- t = 1 (projected CXR features; projection folded into W_in) -------
    pre1 = gates_all[:, 4 * H:] + jnp.dot(
        h1.astype(whh_ref.dtype), whh_ref[...],
        preferred_element_type=jnp.float32)
    ig1, f1, o1 = gate_halves(pre1)
    c2 = f1 * c1 + ig1
    h2 = o1 * jnp.tanh(c2)

    # ---- classifier head: Linear(H -> 4) + Sigmoid, lane-padded to 128 -----
    logits = jnp.dot(h2.astype(wc_ref.dtype), wc_ref[...],
                     preferred_element_type=jnp.float32)
    logits = logits + bc_ref[...].astype(jnp.float32)
    out_ref[...] = jax.nn.sigmoid(logits).astype(out_ref.dtype)


# ---------------------------------------------------------------------------
# Wrapper-side parameter preparation (fold / permute / pad) and pallas_call
# ---------------------------------------------------------------------------
def _permute_gate_cols(w, H):
    """Reorder 4H gate columns from PyTorch's [i, f, g, o] to [i, g, f, o]."""
    return jnp.concatenate(
        [w[..., 0 * H:1 * H], w[..., 2 * H:3 * H],
         w[..., 1 * H:2 * H], w[..., 3 * H:4 * H]], axis=-1)


def prepare_fusion_params(params, compute_dtype=jnp.float32):
    H = D_CXR
    wih_p = _permute_gate_cols(params["wih"], H)                    # (32, 4H)
    whh_p = _permute_gate_cols(params["whh"], H)                    # (64, 4H)
    b_p = _permute_gate_cols(params["bih"] + params["bhh"], H)      # (1, 4H)

    # Fold self.projection (Linear D_CXR -> D_EHR) into the t=1 input weights.
    wx1 = params["wp"] @ wih_p                                      # (64, 4H)
    b1 = params["bp"] @ wih_p + b_p                                 # (1, 4H)

    # Merged block-diagonal input-side weight for both timesteps.
    w_in = jnp.zeros((D_IN, 8 * H), jnp.float32)
    w_in = w_in.at[:D_EHR, :4 * H].set(wih_p)
    w_in = w_in.at[D_EHR:, 4 * H:].set(wx1)
    b_in = jnp.concatenate([b_p, b1], axis=-1)                      # (1, 8H)

    # Classifier head, zero-padded to a lane-dense 128-column output.
    wc_pad = jnp.zeros((H, OUT_PAD), jnp.float32).at[:, :N_CLS].set(params["wc"])
    bc_pad = jnp.zeros((1, OUT_PAD), jnp.float32).at[:, :N_CLS].set(params["bc"])

    c = lambda a: a.astype(compute_dtype)
    return {"w_in": c(w_in), "b_in": c(b_in), "whh": c(whh_p),
            "wc": c(wc_pad), "bc": c(bc_pad)}


def medfuse_fusion(ehr_feats, cxr_feats, params, *,
                   block_b=256, compute_dtype=jnp.float32):
    """Fusion hot path (projection -> 2-step LSTM -> Linear+Sigmoid) in Pallas.

    block_b is the batch tile. 256 rows x (96 in + 512 gate + 128 out) columns
    (double-buffered) plus ~300 KB of resident weights stays far below the
    32 MiB scoped-VMEM default even on v7x (64 MiB physical), so no
    vmem_limit override is needed; raise block_b for more bandwidth if wanted.
    """
    B = ehr_feats.shape[0]
    fp = prepare_fusion_params(params, compute_dtype)

    # TODO(synk): the (B, 96) concat still round-trips HBM between the
    # external backbone outputs and the kernel; fusing the backbones' final
    # projections would require their (external-module) definitions.
    feats = jnp.concatenate([ehr_feats, cxr_feats], axis=-1).astype(compute_dtype)

    tb = min(block_b, _round_up(B, 16))
    tb = _round_up(tb, 16)                 # sublane-friendly for f32 and bf16
    b_pad = _round_up(B, tb)
    if b_pad != B:
        feats = jnp.pad(feats, ((0, b_pad - B), (0, 0)))

    out = pl.pallas_call(
        _medfuse_fusion_kernel,
        out_shape=jax.ShapeDtypeStruct((b_pad, OUT_PAD), jnp.float32),
        grid=(b_pad // tb,),
        in_specs=[
            pl.BlockSpec((tb, D_IN), lambda i: (i, 0)),           # activations
            pl.BlockSpec((D_IN, 8 * D_CXR), lambda i: (0, 0)),    # W_in (resident)
            pl.BlockSpec((1, 8 * D_CXR), lambda i: (0, 0)),       # b_in
            pl.BlockSpec((D_CXR, 4 * D_CXR), lambda i: (0, 0)),   # W_hh
            pl.BlockSpec((D_CXR, OUT_PAD), lambda i: (0, 0)),     # W_cls (padded)
            pl.BlockSpec((1, OUT_PAD), lambda i: (0, 0)),         # b_cls (padded)
        ],
        out_specs=pl.BlockSpec((tb, OUT_PAD), lambda i: (i, 0)),
        compiler_params=pltpu.CompilerParams(
            dimension_semantics=("parallel",)),
    )(feats, fp["w_in"], fp["b_in"], fp["whh"], fp["wc"], fp["bc"])

    return out[:B, :N_CLS]


# ---------------------------------------------------------------------------
# Stand-in backbones (external modules, not defined by medfuse) -- JAX glue.
# ---------------------------------------------------------------------------
def ehr_backbone(x, w, b):
    # TODO(synk): ehr_model is an external module passed to __init__; stand-in
    # = temporal mean + Linear + ReLU producing feats_dim = D_EHR.
    x = jnp.transpose(x, (0, 2, 1))          # (B, F, T) -> (B, T, F) as in forward()
    return jnp.maximum(jnp.mean(x, axis=1) @ w + b, 0.0)


def cxr_backbone(img, w, b):
    # TODO(synk): cxr_model is an external module passed to __init__; stand-in
    # = NCHW global average pool + Linear + ReLU, feats_dim = D_CXR.
    pooled = jnp.mean(img, axis=(2, 3))      # (B, C)
    return jnp.maximum(pooled @ w + b, 0.0)


# ---------------------------------------------------------------------------
# Full forward (backbones in JAX, fusion in Pallas)
# ---------------------------------------------------------------------------
def medfuse_forward(x, img, params, *, block_b=256, compute_dtype=jnp.float32):
    ehr_feats = ehr_backbone(x, params["w_ehr"], params["b_ehr"])    # (B, 32)
    cxr_feats = cxr_backbone(img, params["w_cxr"], params["b_cxr"])  # (B, 64)
    return medfuse_fusion(ehr_feats, cxr_feats, params,
                          block_b=block_b, compute_dtype=compute_dtype)


def _reference_forward(x, img, params):
    """Pure-JAX reference of the unfused math (PyTorch semantics)."""
    ehr = ehr_backbone(x, params["w_ehr"], params["b_ehr"]).astype(jnp.float32)
    cxr = cxr_backbone(img, params["w_cxr"], params["b_cxr"]).astype(jnp.float32)
    proj = cxr @ params["wp"] + params["bp"]
    H = D_CXR
    B = ehr.shape[0]
    h = jnp.zeros((B, H), jnp.float32)
    c = jnp.zeros((B, H), jnp.float32)
    for x_t in (ehr, proj):
        gates = x_t @ params["wih"] + h @ params["whh"] + params["bih"] + params["bhh"]
        i = jax.nn.sigmoid(gates[:, 0 * H:1 * H])
        f = jax.nn.sigmoid(gates[:, 1 * H:2 * H])
        g = jnp.tanh(gates[:, 2 * H:3 * H])
        o = jax.nn.sigmoid(gates[:, 3 * H:4 * H])
        c = f * c + i * g
        h = o * jnp.tanh(c)
    return jax.nn.sigmoid(h @ params["wc"] + params["bc"])


def make_params(key, f_ehr, c_img):
    ks = jax.random.split(key, 12)
    s = 0.1
    return {
        # stand-in backbones
        "w_ehr": s * jax.random.normal(ks[0], (f_ehr, D_EHR), jnp.float32),
        "b_ehr": s * jax.random.normal(ks[1], (1, D_EHR), jnp.float32),
        "w_cxr": s * jax.random.normal(ks[2], (c_img, D_CXR), jnp.float32),
        "b_cxr": s * jax.random.normal(ks[3], (1, D_CXR), jnp.float32),
        # self.projection : Linear(D_CXR, D_EHR)
        "wp": s * jax.random.normal(ks[4], (D_CXR, D_EHR), jnp.float32),
        "bp": s * jax.random.normal(ks[5], (1, D_EHR), jnp.float32),
        # self.lstm_fusion_layer : LSTM(D_EHR -> D_CXR), PyTorch gate order i,f,g,o
        "wih": s * jax.random.normal(ks[6], (D_EHR, 4 * D_CXR), jnp.float32),
        "whh": s * jax.random.normal(ks[7], (D_CXR, 4 * D_CXR), jnp.float32),
        "bih": s * jax.random.normal(ks[8], (1, 4 * D_CXR), jnp.float32),
        "bhh": s * jax.random.normal(ks[9], (1, 4 * D_CXR), jnp.float32),
        # self.lstm_fused_cls : Linear(D_CXR, 4) + Sigmoid
        "wc": s * jax.random.normal(ks[10], (D_CXR, N_CLS), jnp.float32),
        "bc": s * jax.random.normal(ks[11], (1, N_CLS), jnp.float32),
    }


if __name__ == "__main__":
    key = jax.random.PRNGKey(0)
    k_x, k_img, k_p = jax.random.split(key, 3)

    B, F_EHR, T = 2, 16, 8        # EHR:  (B, F, T) -- permuted inside forward
    C, Hh, Ww = 4, 16, 16         # CXR:  NCHW

    x = jax.random.normal(k_x, (B, F_EHR, T), jnp.float32)
    img = jax.random.normal(k_img, (B, C, Hh, Ww), jnp.float32)
    params = make_params(k_p, F_EHR, C)

    ref = jax.block_until_ready(_reference_forward(x, img, params))

    # f32 data-movement path: exact (up to FP reassociation from the folds).
    out = jax.block_until_ready(medfuse_forward(x, img, params))
    assert out.shape == (B, N_CLS)
    assert jnp.allclose(out, ref, atol=1e-5, rtol=1e-5)

    # bf16 data-movement path (v6e/v7x recommendation): f32 accumulation and
    # gate math, so only bf16 rounding of inputs/weights -> loose tolerance.
    out_bf16 = jax.block_until_ready(
        medfuse_forward(x, img, params, compute_dtype=jnp.bfloat16))
    assert out_bf16.shape == (B, N_CLS)
    assert jnp.allclose(out_bf16, ref, atol=3e-2, rtol=3e-2)

    print("KERNEL_OK")
</pallas_src>

<mosaic_0001>
module attributes {stable_mosaic.version = 11 : i64} {
  func.func @_medfuse_fusion_kernel(%arg0: i32, %arg1: memref<16x96xf32, #tpu.memory_space<vmem>>, %arg2: memref<96x512xf32, #tpu.memory_space<vmem>>, %arg3: memref<1x512xf32, #tpu.memory_space<vmem>>, %arg4: memref<64x256xf32, #tpu.memory_space<vmem>>, %arg5: memref<64x128xf32, #tpu.memory_space<vmem>>, %arg6: memref<1x128xf32, #tpu.memory_space<vmem>>, %arg7: memref<16x128xf32, #tpu.memory_space<vmem>>) attributes {dimension_semantics = [#tpu.dimension_semantics<parallel>], iteration_bounds = array<i64: 1>, scalar_prefetch = 0 : i64, scratch_operands = 0 : i64, tpu.core_type = #tpu.core_type<tc>, window_params = [{transform_indices = @transform_0, window_bounds = array<i64: 16, 96>}, {pipeline_mode = #tpu.pipeline_mode<synchronous>, transform_indices = @transform_1, window_bounds = array<i64: 96, 512>}, {pipeline_mode = #tpu.pipeline_mode<synchronous>, transform_indices = @transform_2, window_bounds = array<i64: 1, 512>}, {pipeline_mode = #tpu.pipeline_mode<synchronous>, transform_indices = @transform_3, window_bounds = array<i64: 64, 256>}, {pipeline_mode = #tpu.pipeline_mode<synchronous>, transform_indices = @transform_4, window_bounds = array<i64: 64, 128>}, {pipeline_mode = #tpu.pipeline_mode<synchronous>, transform_indices = @transform_5, window_bounds = array<i64: 1, 128>}, {transform_indices = @transform_6, window_bounds = array<i64: 16, 128>}]} {
    %c0 = arith.constant 0 : index
    %c0_0 = arith.constant 0 : index
    %0 = vector.load %arg1[%c0, %c0_0] : memref<16x96xf32, #tpu.memory_space<vmem>>, vector<16x96xf32>
    %c0_1 = arith.constant 0 : index
    %c0_2 = arith.constant 0 : index
    %1 = vector.load %arg2[%c0_1, %c0_2] : memref<96x512xf32, #tpu.memory_space<vmem>>, vector<96x512xf32>
    %cst = arith.constant dense<0.000000e+00> : vector<16x512xf32>
    %2 = tpu.matmul %0, %1, %cst {dimension_numbers = #tpu.dot_dimension_numbers<[1], [0], [0], [1], [0, 0, 1, 1], [], []>} : vector<16x96xf32>, vector<96x512xf32>, vector<16x512xf32> -> vector<16x512xf32>
    %c0_3 = arith.constant 0 : index
    %c0_4 = arith.constant 0 : index
    %3 = vector.load %arg3[%c0_3, %c0_4] : memref<1x512xf32, #tpu.memory_space<vmem>>, vector<1x512xf32>
    %4 = vector.broadcast %3 : vector<1x512xf32> to vector<16x512xf32>
    %5 = arith.addf %2, %4 : vector<16x512xf32>
    %6 = tpu.iota {dimensions = array<i32: 1>} : vector<16x128xi32>
    %c64_i32 = arith.constant 64 : i32
    %7 = vector.broadcast %c64_i32 : i32 to vector<16x128xi32>
    %8 = arith.cmpi slt, %6, %7 : vector<16x128xi32>
    %9 = vector.extract_strided_slice %5 {offsets = [0, 0], sizes = [16, 256], strides = [1, 1]} : vector<16x512xf32> to vector<16x256xf32>
    %10 = vector.extract_strided_slice %9 {offsets = [0, 0], sizes = [16, 128], strides = [1, 1]} : vector<16x256xf32> to vector<16x128xf32>
    %11 = vector.extract_strided_slice %9 {offsets = [0, 128], sizes = [16, 128], strides = [1, 1]} : vector<16x256xf32> to vector<16x128xf32>
    %12 = arith.negf %10 : vector<16x128xf32>
    %13 = math.exp %12 : vector<16x128xf32>
    %cst_5 = arith.constant 1.000000e+00 : f32
    %14 = vector.broadcast %cst_5 : f32 to vector<16x128xf32>
    %15 = arith.addf %14, %13 : vector<16x128xf32>
    %16 = arith.divf %14, %15 : vector<16x128xf32>
    %17 = math.tanh %10 : vector<16x128xf32>
    %18 = arith.select %8, %16, %17 : vector<16x128xi1>, vector<16x128xf32>
    %19 = arith.negf %11 : vector<16x128xf32>
    %20 = math.exp %19 : vector<16x128xf32>
    %cst_6 = arith.constant 1.000000e+00 : f32
    %21 = vector.broadcast %cst_6 : f32 to vector<16x128xf32>
    %22 = arith.addf %21, %20 : vector<16x128xf32>
    %23 = arith.divf %21, %22 : vector<16x128xf32>
    %c64_i32_7 = arith.constant 64 : i32
    %24 = tpu.dynamic_rotate %18 by %c64_i32_7 dim 1 : vector<16x128xf32>, i32 -> vector<16x128xf32>
    %25 = arith.mulf %18, %24 : vector<16x128xf32>
    %26 = vector.extract_strided_slice %25 {offsets = [0, 0], sizes = [16, 64], strides = [1, 1]} : vector<16x128xf32> to vector<16x64xf32>
    %c64_i32_8 = arith.constant 64 : i32
    %27 = tpu.dynamic_rotate %23 by %c64_i32_8 dim 1 : vector<16x128xf32>, i32 -> vector<16x128xf32>
    %28 = vector.extract_strided_slice %27 {offsets = [0, 0], sizes = [16, 64], strides = [1, 1]} : vector<16x128xf32> to vector<16x64xf32>
    %29 = math.tanh %26 : vector<16x64xf32>
    %30 = arith.mulf %28, %29 : vector<16x64xf32>
    %31 = vector.extract_strided_slice %5 {offsets = [0, 256], sizes = [16, 256], strides = [1, 1]} : vector<16x512xf32> to vector<16x256xf32>
    %c0_9 = arith.constant 0 : index
    %c0_10 = arith.constant 0 : index
    %32 = vector.load %arg4[%c0_9, %c0_10] : memref<64x256xf32, #tpu.memory_space<vmem>>, vector<64x256xf32>
    %cst_11 = arith.constant dense<0.000000e+00> : vector<16x256xf32>
    %33 = tpu.matmul %30, %32, %cst_11 {dimension_numbers = #tpu.dot_dimension_numbers<[1], [0], [0], [1], [0, 0, 1, 1], [], []>} : vector<16x64xf32>, vector<64x256xf32>, vector<16x256xf32> -> vector<16x256xf32>
    %34 = arith.addf %31, %33 : vector<16x256xf32>
    %35 = vector.extract_strided_slice %34 {offsets = [0, 0], sizes = [16, 128], strides = [1, 1]} : vector<16x256xf32> to vector<16x128xf32>
    %36 = vector.extract_strided_slice %34 {offsets = [0, 128], sizes = [16, 128], strides = [1, 1]} : vector<16x256xf32> to vector<16x128xf32>
    %37 = arith.negf %35 : vector<16x128xf32>
    %38 = math.exp %37 : vector<16x128xf32>
    %cst_12 = arith.constant 1.000000e+00 : f32
    %39 = vector.broadcast %cst_12 : f32 to vector<16x128xf32>
    %40 = arith.addf %39, %38 : vector<16x128xf32>
    %41 = arith.divf %39, %40 : vector<16x128xf32>
    %42 = math.tanh %35 : vector<16x128xf32>
    %43 = arith.select %8, %41, %42 : vector<16x128xi1>, vector<16x128xf32>
    %44 = arith.negf %36 : vector<16x128xf32>
    %45 = math.exp %44 : vector<16x128xf32>
    %cst_13 = arith.constant 1.000000e+00 : f32
    %46 = vector.broadcast %cst_13 : f32 to vector<16x128xf32>
    %47 = arith.addf %46, %45 : vector<16x128xf32>
    %48 = arith.divf %46, %47 : vector<16x128xf32>
    %c64_i32_14 = arith.constant 64 : i32
    %49 = tpu.dynamic_rotate %43 by %c64_i32_14 dim 1 : vector<16x128xf32>, i32 -> vector<16x128xf32>
    %50 = arith.mulf %43, %49 : vector<16x128xf32>
    %51 = vector.extract_strided_slice %50 {offsets = [0, 0], sizes = [16, 64], strides = [1, 1]} : vector<16x128xf32> to vector<16x64xf32>
    %52 = vector.extract_strided_slice %48 {offsets = [0, 0], sizes = [16, 64], strides = [1, 1]} : vector<16x128xf32> to vector<16x64xf32>
    %c64_i32_15 = arith.constant 64 : i32
    %53 = tpu.dynamic_rotate %48 by %c64_i32_15 dim 1 : vector<16x128xf32>, i32 -> vector<16x128xf32>
    %54 = vector.extract_strided_slice %53 {offsets = [0, 0], sizes = [16, 64], strides = [1, 1]} : vector<16x128xf32> to vector<16x64xf32>
    %55 = arith.mulf %52, %26 : vector<16x64xf32>
    %56 = arith.addf %55, %51 : vector<16x64xf32>
    %57 = math.tanh %56 : vector<16x64xf32>
    %58 = arith.mulf %54, %57 : vector<16x64xf32>
    %c0_16 = arith.constant 0 : index
    %c0_17 = arith.constant 0 : index
    %59 = vector.load %arg5[%c0_16, %c0_17] : memref<64x128xf32, #tpu.memory_space<vmem>>, vector<64x128xf32>
    %cst_18 = arith.constant dense<0.000000e+00> : vector<16x128xf32>
    %60 = tpu.matmul %58, %59, %cst_18 {dimension_numbers = #tpu.dot_dimension_numbers<[1], [0], [0], [1], [0, 0, 1, 1], [], []>} : vector<16x64xf32>, vector<64x128xf32>, vector<16x128xf32> -> vector<16x128xf32>
    %c0_19 = arith.constant 0 : index
    %c0_20 = arith.constant 0 : index
    %61 = vector.load %arg6[%c0_19, %c0_20] : memref<1x128xf32, #tpu.memory_space<vmem>>, vector<1x128xf32>
    %62 = vector.broadcast %61 : vector<1x128xf32> to vector<16x128xf32>
    %63 = arith.addf %60, %62 : vector<16x128xf32>
    %64 = arith.negf %63 : vector<16x128xf32>
    %65 = math.exp %64 : vector<16x128xf32>
    %cst_21 = arith.constant 1.000000e+00 : f32
    %66 = vector.broadcast %cst_21 : f32 to vector<16x128xf32>
    %67 = arith.addf %66, %65 : vector<16x128xf32>
    %68 = arith.divf %66, %67 : vector<16x128xf32>
    %c0_22 = arith.constant 0 : index
    %c0_23 = arith.constant 0 : index
    %69 = vector.load %arg7[%c0_22, %c0_23] : memref<16x128xf32, #tpu.memory_space<vmem>>, vector<16x128xf32>
    tpu.vector_store %arg7[%c0_22, %c0_23], %68 {strides = array<i32>} : memref<16x128xf32, #tpu.memory_space<vmem>>, vector<16x128xf32>,
    return
  }
  func.func @transform_0(%arg0: i32) -> (i32, i32) {
    %c0_i32 = arith.constant 0 : i32
    %c0_i32_0 = arith.constant 0 : i32
    return %arg0, %c0_i32 : i32, i32
  }
  func.func @transform_1(%arg0: i32) -> (i32, i32) {
    %c0_i32 = arith.constant 0 : i32
    %c0_i32_0 = arith.constant 0 : i32
    %c0_i32_1 = arith.constant 0 : i32
    return %c0_i32, %c0_i32_0 : i32, i32
  }
  func.func @transform_2(%arg0: i32) -> (i32, i32) {
    %c0_i32 = arith.constant 0 : i32
    %c0_i32_0 = arith.constant 0 : i32
    %c0_i32_1 = arith.constant 0 : i32
    return %c0_i32, %c0_i32_0 : i32, i32
  }
  func.func @transform_3(%arg0: i32) -> (i32, i32) {
    %c0_i32 = arith.constant 0 : i32
    %c0_i32_0 = arith.constant 0 : i32
    %c0_i32_1 = arith.constant 0 : i32
    return %c0_i32, %c0_i32_0 : i32, i32
  }
  func.func @transform_4(%arg0: i32) -> (i32, i32) {
    %c0_i32 = arith.constant 0 : i32
    %c0_i32_0 = arith.constant 0 : i32
    %c0_i32_1 = arith.constant 0 : i32
    return %c0_i32, %c0_i32_0 : i32, i32
  }
  func.func @transform_5(%arg0: i32) -> (i32, i32) {
    %c0_i32 = arith.constant 0 : i32
    %c0_i32_0 = arith.constant 0 : i32
    %c0_i32_1 = arith.constant 0 : i32
    return %c0_i32, %c0_i32_0 : i32, i32
  }
  func.func @transform_6(%arg0: i32) -> (i32, i32) {
    %c0_i32 = arith.constant 0 : i32
    %c0_i32_0 = arith.constant 0 : i32
    return %arg0, %c0_i32 : i32, i32
  }
}

</mosaic_0001>

<bundles_post_ra>
// kernel: tpu_custom_call.1
= control target key start
LH: loop header
LB: loop body
LE: loop exit
PB: predicated region body
PF: predicated region fallthrough
CT: control target
= control target key end

     0   :  { %11 = vsyncpa [#allocation3], 0  ;;  %s1135_s0 = inlined_call_operand.hbm [shape: f32[16,96], index: 0, kind: input, shape index: {}]   ;;  %s1136_s1 = inlined_call_operand.hbm [shape: f32[96,512], index: 1, kind: input, shape index: {}]   ;;  %s1137_s2 = inlined_call_operand.vmem [shape: f32[1,512], index: 2, kind: input, shape index: {}]   ;;  %s1138_s3 = inlined_call_operand.hbm [shape: f32[64,256], index: 3, kind: input, shape index: {}]   ;;  %s1139_s4 = inlined_call_operand.hbm [shape: f32[64,128], index: 4, kind: input, shape index: {}]   ;;  %s1140_s5 = inlined_call_operand.vmem [shape: f32[1,128], index: 5, kind: input, shape index: {}]   ;;  %s1141_s6 = inlined_call_operand.hbm [shape: f32[16,128], index: 6, kind: output, shape index: {}]  }
   0x1   :  { %12 = vsyncpa [#allocation6], 0 }
   0x2   :  { %13 = vsyncpa [#allocation9], 0 }
   0x3   :  { %14 = vsyncpa [#allocation4], 0  ;;  %s959_s21 = smov [#allocation5]   ;;  %s841_s25 = scalar_lea.hbm %s1136_s1, 6144 }
   0x4   :  { %s32_s22 = sshll.u32 %s959_s21, 4  ;;  %p842_p0 = scmp.ne.s32.totalorder %s1136_s1, %s841_s25  ;;  %s33_s22 = int_to_ptr.vmem [resolvable:$true] %s32_s22 }
   0x5   :  { %p845_p1 = scmp.lt.u32.totalorder %s841_s25, %s1136_s1 }
   0x7   :  { %p847_p2 = pnand %p845_p1, %p842_p0 }
   0x9   :  { %850 = shalt.err (!%p847_p2)
}
   0xa   :  { %s851_s30 = scalar_lea.vmem %s33_s22, 6144  ;;  %p856_p4 = scmp.lt.s32.totalorder %s33_s22, %s33_s22 }
   0xb   :  { %p852_p3 = scmp.ne.s32.totalorder %s33_s22, %s851_s30  ;;  %p857_p5 = scmp.lt.s32.totalorder %s851_s30, %s851_s30 }
   0xd   :  { %p858_p6 = por %p857_p5, %p856_p4 }
   0xf   :  { %p859_p7 = pnand %p858_p6, %p852_p3 }
  0x11   :  { %862 = shalt.err (!%p859_p7)
}
  0x12   :  { %s960_s7 = smov 512   ;;  %s961_s8 = smov 32  }
  0x13   :  { %38 = dma.hbm_to_vmem [thread:$0]  %s1136_s1, 6144, %s33_s22, [#allocation6], %s960_s7, %s960_s7, %s961_s8  }
  0x14   :  { %s962_s11 = smov [#allocation2]   ;;  %s863_s15 = scalar_lea.hbm %s1135_s0, 256 }
  0x15   :  { %s20_s12 = sshll.u32 %s962_s11, 4  ;;  %p864_p8 = scmp.ne.s32.totalorder %s1135_s0, %s863_s15  ;;  %s21_s12 = int_to_ptr.vmem [resolvable:$true] %s20_s12 }
  0x16   :  { %p867_p9 = scmp.lt.u32.totalorder %s863_s15, %s1135_s0 }
  0x18   :  { %p869_p10 = pnand %p867_p9, %p864_p8 }
  0x1a   :  { %872 = shalt.err (!%p869_p10)
}
  0x1b   :  { %s873_s20 = scalar_lea.vmem %s21_s12, 256  ;;  %p878_p12 = scmp.lt.s32.totalorder %s21_s12, %s21_s12 }
  0x1c   :  { %p874_p11 = scmp.ne.s32.totalorder %s21_s12, %s873_s20  ;;  %p879_p13 = scmp.lt.s32.totalorder %s873_s20, %s873_s20 }
  0x1e   :  { %p880_p0 = por %p879_p13, %p878_p12 }
  0x20   :  { %p881_p1 = pnand %p880_p0, %p874_p11 }
  0x22   :  { %884 = shalt.err (!%p881_p1)
}
  0x23   :  { %s963_s1 = smov 128   ;;  %s964_s21 = smov 8  }
  0x24   :  { %26 = dma.hbm_to_vmem [thread:$0]  %s1135_s0, 256, %s21_s12, [#allocation3], %s963_s1, %s963_s1, %s964_s21  }
  0x25   :  { %s965_s24 = smov [#allocation7]   ;;  %s885_s28 = scalar_lea.hbm %s1138_s3, 2048 }
  0x26   :  { %s46_s25 = sshll.u32 %s965_s24, 4  ;;  %p886_p2 = scmp.ne.s32.totalorder %s1138_s3, %s885_s28  ;;  %s47_s25 = int_to_ptr.vmem [resolvable:$true] %s46_s25 }
  0x27   :  { %p889_p3 = scmp.lt.u32.totalorder %s885_s28, %s1138_s3 }
  0x29   :  { %p891_p4 = pnand %p889_p3, %p886_p2 }
  0x2b   :  { %894 = shalt.err (!%p891_p4)
}
  0x2c   :  { %s895_s9 = scalar_lea.vmem %s47_s25, 2048  ;;  %p900_p6 = scmp.lt.s32.totalorder %s47_s25, %s47_s25 }
  0x2d   :  { %p896_p5 = scmp.ne.s32.totalorder %s47_s25, %s895_s9  ;;  %p901_p7 = scmp.lt.s32.totalorder %s895_s9, %s895_s9 }
  0x2f   :  { %p902_p8 = por %p901_p7, %p900_p6 }
  0x31   :  { %p903_p9 = pnand %p902_p8, %p896_p5 }
  0x33   :  { %906 = shalt.err (!%p903_p9)
}
  0x34   :  { %s966_s0 = smov 256   ;;  %s967_s10 = smov 16  }
  0x35   :  { %52 = dma.hbm_to_vmem [thread:$0]  %s1138_s3, 2048, %s47_s25, [#allocation6], %s966_s0, %s966_s0, %s967_s10  }
  0x36   :  { %s968_s13 = smov [#allocation8]   ;;  %s907_s17 = scalar_lea.hbm %s1139_s4, 1024 }
  0x37   :  { %s58_s14 = sshll.u32 %s968_s13, 4  ;;  %p908_p10 = scmp.ne.s32.totalorder %s1139_s4, %s907_s17  ;;  %s59_s14 = int_to_ptr.vmem [resolvable:$true] %s58_s14 }
  0x38   :  { %p911_p11 = scmp.lt.u32.totalorder %s907_s17, %s1139_s4 }
  0x3a   :  { %p913_p12 = pnand %p911_p11, %p908_p10 }
  0x3c   :  { %916 = shalt.err (!%p913_p12)
}
  0x3d   :  { %s917_s23 = scalar_lea.vmem %s59_s14, 1024  ;;  %p922_p0 = scmp.lt.s32.totalorder %s59_s14, %s59_s14 }
  0x3e   :  { %p918_p13 = scmp.ne.s32.totalorder %s59_s14, %s917_s23  ;;  %p923_p1 = scmp.lt.s32.totalorder %s917_s23, %s917_s23 }
  0x40   :  { %p924_p2 = por %p923_p1, %p922_p0 }
  0x42   :  { %p925_p3 = pnand %p924_p2, %p918_p13 }
  0x44   :  { %928 = shalt.err (!%p925_p3)
}
  0x45   :  { %64 = dma.hbm_to_vmem [thread:$0]  %s1139_s4, 1024, %s59_s14, [#allocation9], %s963_s1, %s963_s1, %s964_s21  }
  0x46   :  { %951 = dma.done.wait [#allocation3], 256  }
  0x47   :  { %952 = vsyncadd [#allocation3], 4294967040 }
  0x48   :  { %953 = dma.done.wait [#allocation6], 8192  }
  0x49   :  { %954 = vsyncadd [#allocation6], 4294959104 }
  0x4a   :  { %955 = dma.done.wait [#allocation9], 1024  }
  0x4b   :  { %956 = vsyncadd [#allocation9], 4294966272  ;;  %v969_v0 = vmov 0.0   ;;  %v82_v1 = vld [vmem:[#allocation5 + $0x8] sm:$0xff]  ;;  %v81_v3 = vld [vmem:[#allocation5] sm:$0xff]  ;;  %vm151_vm0 = vcmask 785408  }
  0x4c   :  { %222 = vmatprep.mubr.f32.mxu0 %v969_v0  ;;  %299 = vmatprep.mubr.f32.mxu1 %v969_v0  ;;  %v86_v2 = vld [vmem:[#allocation5 + $0x28] sm:$0xff]  ;;  %v85_v5 = vld [vmem:[#allocation5 + $0x20] sm:$0xff]  ;;  %v79_v37 = vld [vmem:[#allocation2] sm:$0xff]  ;;  %vm373_vm2 = vcmask 523264   ;;  %s971_s28 = smov [#allocation10]  }
  0x4d   :  { %v684_v4 = vpack.c.bf16 %v86_v2, %v82_v1  ;;  %v90_v6 = vld [vmem:[#allocation5 + $0x48] sm:$0xff]  ;;  %v686_v8 = vpack.c.bf16 %v85_v5, %v81_v3  ;;  %v89_v10 = vld [vmem:[#allocation5 + $0x40] sm:$0xff]  ;;  %v80_v38 = vld [vmem:[#allocation2 + $0x8] sm:$0xff]  ;;  %s622_s29 = sshll.u32 %s971_s28, 4  ;;  %s623_s29 = int_to_ptr.vmem [resolvable:$true] %s622_s29 }
  0x4e   :  { %v94_v7 = vld [vmem:[#allocation5 + $0x68] sm:$0xff]  ;;  %v93_v11 = vld [vmem:[#allocation5 + $0x60] sm:$0xff]  ;;  %v84_v39 = vld [vmem:[#allocation5 + $0x18] sm:$0xff]  ;;  %p934_p5 = scmp.lt.s32.totalorder %s623_s29, %s623_s29 }
  0x4f   :  { %v688_v9 = vpack.c.bf16 %v94_v7, %v90_v6  ;;  %v98_v12 = vld [vmem:[#allocation5 + $0x88] sm:$0xff]  ;;  %685 = vmatprep.subr.bf16.mxu0 %v684_v4  ;;  %v690_v14 = vpack.c.bf16 %v93_v11, %v89_v10  ;;  %v97_v16 = vld [vmem:[#allocation5 + $0x80] sm:$0xff]  ;;  %v88_v40 = vld [vmem:[#allocation5 + $0x38] sm:$0xff] }
  0x50   :  { %v102_v13 = vld [vmem:[#allocation5 + $0xa8] sm:$0xff]  ;;  %687 = vmatpush1.bf16.msra.mxu0 %v686_v8  ;;  %v101_v17 = vld [vmem:[#allocation5 + $0xa0] sm:$0xff]  ;;  %v83_v41 = vld [vmem:[#allocation5 + $0x10] sm:$0xff]  ;;  %v708_v42 = vpack.c.bf16 %v88_v40, %v84_v39 }
  0x51   :  { %689 = vmatprep.subr.bf16.mxu0 %v688_v9  ;;  %v692_v15 = vpack.c.bf16 %v102_v13, %v98_v12  ;;  %v106_v18 = vld [vmem:[#allocation5 + $0xc8] sm:$0xff]  ;;  %v694_v20 = vpack.c.bf16 %v101_v17, %v97_v16  ;;  %v105_v22 = vld [vmem:[#allocation5 + $0xc0] sm:$0xff]  ;;  %v87_v43 = vld [vmem:[#allocation5 + $0x30] sm:$0xff] }
  0x52   :  { %v110_v19 = vld [vmem:[#allocation5 + $0xe8] sm:$0xff]  ;;  %v109_v23 = vld [vmem:[#allocation5 + $0xe0] sm:$0xff]  ;;  %v92_v44 = vld [vmem:[#allocation5 + $0x58] sm:$0xff]  ;;  %v710_v46 = vpack.c.bf16 %v87_v43, %v83_v41  ;;  %709 = vmatprep.subr.bf16.mxu1 %v708_v42 }
  0x53   :  { %v696_v21 = vpack.c.bf16 %v110_v19, %v106_v18  ;;  %v114_v24 = vld [vmem:[#allocation5 + $0x108] sm:$0xff]  ;;  %v698_v26 = vpack.c.bf16 %v109_v23, %v105_v22  ;;  %v113_v28 = vld [vmem:[#allocation5 + $0x100] sm:$0xff]  ;;  %v96_v45 = vld [vmem:[#allocation5 + $0x78] sm:$0xff] }
  0x54   :  { %691 = vmatpush1.bf16.msra.mxu0 %v690_v14  ;;  %v118_v25 = vld [vmem:[#allocation5 + $0x128] sm:$0xff]  ;;  %v117_v29 = vld [vmem:[#allocation5 + $0x120] sm:$0xff]  ;;  %v712_v47 = vpack.c.bf16 %v96_v45, %v92_v44  ;;  %v91_v48 = vld [vmem:[#allocation5 + $0x50] sm:$0xff]  ;;  %711 = vmatpush1.bf16.msra.mxu1 %v710_v46 }
  0x55   :  { %693 = vmatprep.subr.bf16.mxu0 %v692_v15  ;;  %v700_v27 = vpack.c.bf16 %v118_v25, %v114_v24  ;;  %v122_v30 = vld [vmem:[#allocation5 + $0x148] sm:$0xff]  ;;  %v702_v32 = vpack.c.bf16 %v117_v29, %v113_v28  ;;  %v121_v34 = vld [vmem:[#allocation5 + $0x140] sm:$0xff]  ;;  %v95_v49 = vld [vmem:[#allocation5 + $0x70] sm:$0xff]  ;;  %v131_v15 = vlaneseq }
  0x56   :  { %v126_v31 = vld [vmem:[#allocation5 + $0x168] sm:$0xff]  ;;  %v125_v35 = vld [vmem:[#allocation5 + $0x160] sm:$0xff]  ;;  %v100_v50 = vld [vmem:[#allocation5 + $0x98] sm:$0xff]  ;;  %v714_v52 = vpack.c.bf16 %v95_v49, %v91_v48  ;;  %713 = vmatprep.subr.bf16.mxu1 %v712_v47 }
  0x57   :  { %v704_v33 = vpack.c.bf16 %v126_v31, %v122_v30  ;;  %v706_v36 = vpack.c.bf16 %v125_v35, %v121_v34  ;;  %v104_v51 = vld [vmem:[#allocation5 + $0xb8] sm:$0xff]  ;;  %v99_v54 = vld [vmem:[#allocation5 + $0x90] sm:$0xff]  ;;  %v358_v11 = vld [vmem:[#allocation7 + $0x8] sm:$0xff]  ;;  %v1070_v16 = vshrl.u32 %v131_v15, 7 }
  0x58   :  { %695 = vmatpush1.bf16.msra.mxu0 %v694_v20  ;;  %v716_v53 = vpack.c.bf16 %v104_v51, %v100_v50  ;;  %v103_v55 = vld [vmem:[#allocation5 + $0xb0] sm:$0xff]  ;;  %v108_v56 = vld [vmem:[#allocation5 + $0xd8] sm:$0xff]  ;;  %715 = vmatpush1.bf16.msra.mxu1 %v714_v52  ;;  %v357_v34 = vld [vmem:[#allocation7] sm:$0xff] }
  0x59   :  { %697 = vmatprep.subr.bf16.mxu0 %v696_v21  ;;  %v112_v57 = vld [vmem:[#allocation5 + $0xf8] sm:$0xff]  ;;  %v718_v58 = vpack.c.bf16 %v103_v55, %v99_v54  ;;  %v107_v60 = vld [vmem:[#allocation5 + $0xd0] sm:$0xff]  ;;  %v133_v17 = vsub.s32 0, %v1070_v16  ;;  %v137_v19 = vsub.s32 1, %v1070_v16  ;;  %v362_v41 = vld [vmem:[#allocation7 + $0x28] sm:$0xff] }
  0x5a   :  { %717 = vmatprep.subr.bf16.mxu1 %v716_v53  ;;  %v720_v59 = vpack.c.bf16 %v112_v57, %v108_v56  ;;  %v111_v61 = vld [vmem:[#allocation5 + $0xf0] sm:$0xff]  ;;  %v116_v62 = vld [vmem:[#allocation5 + $0x118] sm:$0xff]  ;;  %v361_v44 = vld [vmem:[#allocation7 + $0x20] sm:$0xff]  ;;  %v1081_v53 = vand.u32 127, %v131_v15 }
  0x5b   :  { %v120_v63 = vld [vmem:[#allocation5 + $0x138] sm:$0xff]  ;;  %v722_v1 = vpack.c.bf16 %v111_v61, %v107_v60  ;;  %v115_v3 = vld [vmem:[#allocation5 + $0x110] sm:$0xff]  ;;  %v366_v51 = vld [vmem:[#allocation7 + $0x48] sm:$0xff] }
  0x5c   :  { %699 = vmatpush1.bf16.msra.mxu0 %v698_v26  ;;  %719 = vmatpush1.bf16.msra.mxu1 %v718_v58  ;;  %v724_v2 = vpack.c.bf16 %v120_v63, %v116_v62  ;;  %v119_v4 = vld [vmem:[#allocation5 + $0x130] sm:$0xff]  ;;  %v124_v5 = vld [vmem:[#allocation5 + $0x158] sm:$0xff]  ;;  %v365_v55 = vld [vmem:[#allocation7 + $0x40] sm:$0xff]  ;;  %vm314_vm1 = vcmp.lt.s32.totalorder %v1081_v53, 64 }
  0x5d   :  { %701 = vmatprep.subr.bf16.mxu0 %v700_v27  ;;  %721 = vmatprep.subr.bf16.mxu1 %v720_v59  ;;  %v128_v6 = vld [vmem:[#allocation5 + $0x178] sm:$0xff]  ;;  %v726_v7 = vpack.c.bf16 %v119_v4, %v115_v3  ;;  %v123_v9 = vld [vmem:[#allocation5 + $0x150] sm:$0xff]  ;;  %v370_v58 = vld [vmem:[#allocation7 + $0x68] sm:$0xff] }
  0x5e   :  { %v728_v8 = vpack.c.bf16 %v128_v6, %v124_v5  ;;  %v127_v10 = vld [vmem:[#allocation5 + $0x170] sm:$0xff]  ;;  %v360_v12 = vld [vmem:[#allocation7 + $0x18] sm:$0xff]  ;;  %v369_v61 = vld [vmem:[#allocation7 + $0x60] sm:$0xff] }
  0x5f   :  { %v730_v13 = vpack.c.bf16 %v127_v10, %v123_v9  ;;  %v732_v14 = vpack.c.bf16 %v360_v12, %v358_v11  ;;  %v1076_v18 = vld [vmem:[%s1137_s2] sm:$0xf]  ;;  %v364_v42 = vld [vmem:[#allocation7 + $0x38] sm:$0xff]  ;;  %s970_s2 = smov 64  }
  0x60   :  { %703 = vmatpush1.bf16.msra.mxu0 %v702_v32  ;;  %723 = vmatpush1.bf16.msra.mxu1 %v722_v1  ;;  %v134_v20 = vrot.slane %v1076_v18, %v133_v17  ;;  %v138_v21 = vrot.slane %v1076_v18, %v137_v19  ;;  %v359_v35 = vld [vmem:[#allocation7 + $0x10] sm:$0xff]  ;;  %v736_v43 = vpack.c.bf16 %v364_v42, %v362_v41  ;;  %v368_v52 = vld [vmem:[#allocation7 + $0x58] sm:$0xff] }
  0x61   :  { %705 = vmatprep.subr.bf16.mxu0 %v704_v33  ;;  %725 = vmatprep.subr.bf16.mxu1 %v724_v2  ;;  %v363_v45 = vld [vmem:[#allocation7 + $0x30] sm:$0xff]  ;;  %v740_v54 = vpack.c.bf16 %v368_v52, %v366_v51  ;;  %v372_v59 = vld [vmem:[#allocation7 + $0x78] sm:$0xff] }
  0x62   :  { %v738_v47 = vpack.c.bf16 %v363_v45, %v361_v44  ;;  %v367_v56 = vld [vmem:[#allocation7 + $0x50] sm:$0xff]  ;;  %v744_v60 = vpack.c.bf16 %v372_v59, %v370_v58 }
  0x63   :  { %v742_v57 = vpack.c.bf16 %v367_v56, %v365_v55  ;;  %v371_v62 = vld [vmem:[#allocation7 + $0x70] sm:$0xff] }
  0x64   :  { %707 = vmatpush1.bf16.msra.mxu0 %v706_v36  ;;  %727 = vmatpush1.bf16.msra.mxu1 %v726_v7  ;;  %v746_v1 = vpack.c.bf16 %v371_v62, %v369_v61  ;;  %v509_v45 = vld [vmem:[#allocation8 + $0x10] sm:$0xff] }
  0x65   :  { %729 = vmatprep.subr.bf16.mxu1 %v728_v8  ;;  %v513_v56 = vld [vmem:[#allocation8 + $0x30] sm:$0xff] }
  0x67   :  { %636 = vmatmul.mubr.msk.f32.vlgmr.msra.gmra.mrb[0].mxu0 %vm151_vm0, %v79_v37 }
  0x68   :  { %228 = vmatprep.mubr.f32.mxu0 %v969_v0  ;;  %731 = vmatpush1.bf16.msra.mxu1 %v730_v13 }
  0x69   :  { %733 = vmatprep.subr.bf16.mxu1 %v732_v14 }
  0x6b   :  { %637 = vmatmul.mubr.msk.f32.gmra.mrb[2].mxu0 %vm151_vm0, %v80_v38  ;;  %638 = vmatmul.mubr.msk.f32.vlgmr.msra.gmra.mrb[0].mxu1 %vm151_vm0, %v79_v37  ;;  %v734_v37 = vpack.c.bf16 %v359_v35, %v357_v34 }
  0x6c   :  { %305 = vmatprep.mubr.f32.mxu1 %v969_v0 }
  0x6d   :  { %735 = vmatpush1.bf16.msra.mxu1 %v734_v37 }
  0x6e   :  { %737 = vmatprep.subr.bf16.mxu1 %v736_v43 }
  0x6f   :  { %639 = vmatmul.mubr.msk.f32.gmra.mrb[2].mxu1 %vm151_vm0, %v80_v38 }
  0x70   :  { %444 = vmatprep.mubr.f32.mxu1 %v969_v0 }
  0x71   :  { %739 = vmatpush1.bf16.msra.mxu1 %v738_v47 }
  0x72   :  { %741 = vmatprep.subr.bf16.mxu1 %v740_v54 }
  0x75   :  { %743 = vmatpush1.bf16.msra.mxu1 %v742_v57  ;;  %v514_v57 = vld [vmem:[#allocation8 + $0x38] sm:$0xff] }
  0x76   :  { %745 = vmatprep.subr.bf16.mxu1 %v744_v60  ;;  %v760_v59 = vpack.c.bf16 %v514_v57, %v513_v56 }
  0x79   :  { %747 = vmatpush1.bf16.msra.mxu1 %v746_v1 }
 0x13a   :  { %v224_v22 = vpop.f32.mrb[0].mxu0 }
 0x13b   :  { %v225_v23 = vadd.f32 %v224_v22, %v134_v20  ;;  %v226_v24 = vpop.f32.mrb[1].mxu0  ;;  %v145_v22 = vsub.s32 3, %v1070_v16 }
 0x13c   :  { %v227_v25 = vadd.f32 %v226_v24, %v138_v21 }
 0x13d   :  { %v640_v26 = vmul.f32 -1.442695, %v225_v23  ;;  %v146_v24 = vrot.slane %v1076_v18, %v145_v22 }
 0x13e   :  { %v642_v27 = vmul.f32 -1.442695, %v227_v25  ;;  %v230_v28 = vpop.f32.mrb[2].mxu0 }
 0x13f   :  { %785 = vpow2.f32 %v640_v26  ;;  %v231_v29 = vadd.f32 %v230_v28, %v134_v20  ;;  %v232_v30 = vpop.f32.mrb[3].mxu0 }
 0x140   :  { %787 = vpow2.f32 %v642_v27  ;;  %v233_v31 = vadd.f32 %v232_v30, %v138_v21  ;;  %v141_v21 = vsub.s32 2, %v1070_v16 }
 0x141   :  { %v641_v32 = vmul.f32 -1.442695, %v231_v29 }
 0x142   :  { %v643_v33 = vmul.f32 -1.442695, %v233_v31 }
 0x143   :  { %789 = vpow2.f32 %v641_v32 }
 0x144   :  { %791 = vpow2.f32 %v643_v33 }
 0x145   :  { %793 = vtanh.f32 %v225_v23  ;;  %v142_v23 = vrot.slane %v1076_v18, %v141_v21 }
 0x149   :  { %v786_v36 = vpop.eup %785 }
 0x14a   :  { %v788_v38 = vpop.eup %787  ;;  %v321_v39 = vadd.f32 1.0, %v786_v36 }
 0x14b   :  { %v337_v40 = vadd.f32 1.0, %v788_v38 }
 0x14c   :  { %795 = vrcp.f32 %v321_v39  ;;  %v507_v39 = vld [vmem:[#allocation8] sm:$0xff] }
 0x14d   :  { %v790_v46 = vpop.eup %789  ;;  %797 = vrcp.f32 %v337_v40  ;;  %v508_v40 = vld [vmem:[#allocation8 + $0x8] sm:$0xff] }
 0x14e   :  { %v792_v48 = vpop.eup %791  ;;  %v322_v49 = vadd.f32 1.0, %v790_v46  ;;  %799 = vtanh.f32 %v231_v29  ;;  %v748_v43 = vpack.c.bf16 %v508_v40, %v507_v39  ;;  %v510_v46 = vld [vmem:[#allocation8 + $0x18] sm:$0xff] }
 0x14f   :  { %v338_v50 = vadd.f32 1.0, %v792_v48  ;;  %v794_v63 = vpop.eup %793  ;;  %v752_v47 = vpack.c.bf16 %v510_v46, %v509_v45 }
 0x150   :  { %801 = vrcp.f32 %v322_v49  ;;  %749 = vmatprep.subr.bf16.mxu0 %v748_v43  ;;  %v511_v49 = vld [vmem:[#allocation8 + $0x20] sm:$0xff] }
 0x151   :  { %803 = vrcp.f32 %v338_v50  ;;  %751 = vmatpush3.bf16.msra.mxu0 %v748_v43  ;;  %v512_v50 = vld [vmem:[#allocation8 + $0x28] sm:$0xff] }
 0x152   :  { %753 = vmatprep.subr.bf16.mxu0 %v752_v47  ;;  %v756_v52 = vpack.c.bf16 %v512_v50, %v511_v49 }
 0x155   :  { %755 = vmatpush3.bf16.msra.mxu0 %v752_v47 }
 0x156   :  { %v796_v2 = vpop.eup %795  ;;  %757 = vmatprep.subr.bf16.mxu0 %v756_v52 }
 0x157   :  { %v798_v3 = vpop.eup %797  ;;  %v329_v4 = vsel %vm314_vm1, %v796_v2, %v794_v63 }
 0x158   :  { %349 = vrot.lane.b32.xlu1 %v798_v3, %s970_s2  ;;  %343 = vrot.lane.b32.xlu0 %v329_v4, %s970_s2  ;;  %v800_v5 = vpop.eup %799 }
 0x159   :  { %759 = vmatpush3.bf16.msra.mxu0 %v756_v52 }
 0x15a   :  { %v802_v6 = vpop.eup %801  ;;  %761 = vmatprep.subr.bf16.mxu0 %v760_v59 }
 0x15b   :  { %v804_v7 = vpop.eup %803  ;;  %v330_v8 = vsel %vm314_vm1, %v802_v6, %v800_v5 }
 0x15c   :  { %351 = vrot.lane.b32.xlu1 %v804_v7, %s970_s2  ;;  %345 = vrot.lane.b32.xlu0 %v330_v8, %s970_s2 }
 0x15d   :  { %763 = vmatpush3.bf16.msra.mxu0 %v760_v59 }
 0x1ca   :  { %v344_v9 = vpop.permute.xlu0 %343  ;;  %v350_v13 = vpop.permute.xlu1 %349 }
 0x1cb   :  { %v1092_v10 = vmul.f32 %v344_v9, %v329_v4 }
 0x1cd   :  { %805 = vtanh.f32 %v1092_v10 }
 0x1ce   :  { %v346_v11 = vpop.permute.xlu0 %345  ;;  %v352_v19 = vpop.permute.xlu1 %351 }
 0x1cf   :  { %v1095_v12 = vmul.f32 %v346_v11, %v330_v8 }
 0x1d1   :  { %807 = vtanh.f32 %v1095_v12 }
 0x1d7   :  { %v806_v14 = vpop.eup %805 }
 0x1d8   :  { %v355_v15 = vmul.f32 %v806_v14, %v350_v13 }
 0x1da   :  { %644 = vmatmul.mubr.msk.f32.vlgmr.msra.gmra.mrb[0].mxu1 %vm373_vm2, %v355_v15 }
 0x1db   :  { %v808_v17 = vpop.eup %807  ;;  %450 = vmatprep.mubr.f32.mxu1 %v969_v0 }
 0x1dc   :  { %v356_v20 = vmul.f32 %v808_v17, %v352_v19 }
 0x1de   :  { %645 = vmatmul.mubr.msk.f32.gmra.mrb[2].mxu1 %vm373_vm2, %v356_v20 }
 0x2ad   :  { %v446_v25 = vpop.f32.mrb[0].mxu1 }
 0x2ae   :  { %v764_v26 = vadd.f32 %v446_v25, %v142_v23  ;;  %v448_v27 = vpop.f32.mrb[1].mxu1 }
 0x2af   :  { %v765_v28 = vadd.f32 %v448_v27, %v146_v24 }
 0x2b0   :  { %v646_v29 = vmul.f32 -1.442695, %v764_v26 }
 0x2b1   :  { %v648_v30 = vmul.f32 -1.442695, %v765_v28  ;;  %v452_v31 = vpop.f32.mrb[2].mxu1 }
 0x2b2   :  { %809 = vpow2.f32 %v646_v29  ;;  %v766_v0 = vadd.f32 %v452_v31, %v142_v23  ;;  %v454_v32 = vpop.f32.mrb[3].mxu1 }
 0x2b3   :  { %811 = vpow2.f32 %v648_v30  ;;  %v767_v33 = vadd.f32 %v454_v32, %v146_v24 }
 0x2b4   :  { %v647_v34 = vmul.f32 -1.442695, %v766_v0 }
 0x2b5   :  { %v649_v35 = vmul.f32 -1.442695, %v767_v33 }
 0x2b6   :  { %813 = vpow2.f32 %v647_v34 }
 0x2b7   :  { %815 = vpow2.f32 %v649_v35 }
 0x2b8   :  { %817 = vtanh.f32 %v764_v26 }
 0x2bc   :  { %v810_v16 = vpop.eup %809 }
 0x2bd   :  { %v812_v36 = vpop.eup %811  ;;  %v467_v37 = vadd.f32 1.0, %v810_v16 }
 0x2be   :  { %v483_v38 = vadd.f32 1.0, %v812_v36 }
 0x2bf   :  { %819 = vrcp.f32 %v467_v37 }
 0x2c0   :  { %v814_v18 = vpop.eup %813  ;;  %821 = vtanh.f32 %v766_v0 }
 0x2c1   :  { %v816_v41 = vpop.eup %815  ;;  %v468_v42 = vadd.f32 1.0, %v814_v18 }
 0x2c2   :  { %v484_v44 = vadd.f32 1.0, %v816_v41  ;;  %v818_v48 = vpop.eup %817 }
 0x2c3   :  { %823 = vrcp.f32 %v468_v42 }
 0x2c4   :  { %825 = vrcp.f32 %v483_v38 }
 0x2c5   :  { %827 = vrcp.f32 %v484_v44 }
 0x2c9   :  { %v820_v51 = vpop.eup %819 }
 0x2ca   :  { %v475_v54 = vsel %vm314_vm1, %v820_v51, %v818_v48  ;;  %v822_v55 = vpop.eup %821 }
 0x2cb   :  { %489 = vrot.lane.b32.xlu0 %v475_v54, %s970_s2 }
 0x2cd   :  { %v824_v58 = vpop.eup %823 }
 0x2ce   :  { %v826_v60 = vpop.eup %825  ;;  %v476_v61 = vsel %vm314_vm1, %v824_v58, %v822_v55 }
 0x2cf   :  { %495 = vrot.lane.b32.xlu0 %v826_v60, %s970_s2  ;;  %491 = vrot.lane.b32.xlu1 %v476_v61, %s970_s2  ;;  %v828_v62 = vpop.eup %827  ;;  %v499_v1 = vmul.f32 %v826_v60, %v1092_v10  ;;  %v650_v10 = vld [vmem:[%s1140_s5] ss:$0 sm:$0xff]  ;;  %s929_s5 = scalar_lea.vmem %s623_s29, 256 }
 0x2d0   :  { %v500_v53 = vmul.f32 %v828_v62, %v1095_v12  ;;  %p930_p4 = scmp.ne.s32.totalorder %s623_s29, %s929_s5  ;;  %p935_p6 = scmp.lt.s32.totalorder %s929_s5, %s929_s5 }
 0x2d2   :  { %p936_p7 = por %p935_p6, %p934_p5 }
 0x2d3   :  { %497 = vrot.lane.b32.xlu1 %v828_v62, %s970_s2 }
 0x2d4   :  { %p937_p8 = pnand %p936_p7, %p930_p4 }
 0x33d   :  { %v490_v63 = vpop.permute.xlu0 %489 }
 0x33e   :  { %v493_v2 = vmul.f32 %v490_v63, %v475_v54 }
 0x340   :  { %v501_v3 = vadd.f32 %v499_v1, %v493_v2 }
 0x341   :  { %v492_v4 = vpop.permute.xlu1 %491  ;;  %v496_v8 = vpop.permute.xlu0 %495 }
 0x342   :  { %829 = vtanh.f32 %v501_v3  ;;  %v494_v5 = vmul.f32 %v492_v4, %v476_v61 }
 0x344   :  { %v502_v6 = vadd.f32 %v500_v53, %v494_v5 }
 0x345   :  { %v498_v13 = vpop.permute.xlu1 %497 }
 0x346   :  { %831 = vtanh.f32 %v502_v6 }
 0x34c   :  { %v830_v7 = vpop.eup %829 }
 0x34d   :  { %v505_v9 = vmul.f32 %v830_v7, %v496_v8 }
 0x34f   :  { %681 = vmatprep.mubr.msk.f32.mxu0 %vm373_vm2, %v505_v9 }
 0x350   :  { %v832_v11 = vpop.eup %831 }
 0x351   :  { %v506_v14 = vmul.f32 %v832_v11, %v498_v13 }
 0x353   :  { %682 = vmatmul.mubr.msk.f32.vlgmr.msra.gmra.mrb[4].mxu0 %vm373_vm2, %v506_v14 }
 0x426   :  { %v683_v15 = vpop.f32.mrb[4].mxu0 }
 0x427   :  { %v600_v17 = vadd.f32 %v683_v15, %v650_v10  ;;  %v594_v19 = vpop.f32.mrb[5].mxu0 }
 0x428   :  { %v595_v12 = vadd.f32 %v650_v10, %v594_v19 }
 0x429   :  { %v654_v20 = vmul.f32 -1.442695, %v600_v17 }
 0x42a   :  { %v653_v21 = vmul.f32 -1.442695, %v595_v12 }
 0x42b   :  { %833 = vpow2.f32 %v654_v20 }
 0x42c   :  { %835 = vpow2.f32 %v653_v21 }
 0x435   :  { %v834_v22 = vpop.eup %833 }
 0x436   :  { %v836_v23 = vpop.eup %835  ;;  %v610_v24 = vadd.f32 1.0, %v834_v22 }
 0x437   :  { %v609_v25 = vadd.f32 1.0, %v836_v23 }
 0x438   :  { %837 = vrcp.f32 %v610_v24 }
 0x439   :  { %839 = vrcp.f32 %v609_v25 }
 0x442   :  { %v838_v26 = vpop.eup %837 }
 0x443   :  { %v840_v27 = vpop.eup %839  ;;  %616 = vst [vmem:[#allocation10 + $0x8] sm:$0xff] %v838_v26 }
 0x444   :  { %615 = vst [vmem:[#allocation10] sm:$0xff] %v840_v27 }
 0x445   :  { %940 = shalt.err (!%p937_p8)
}
 0x446   :  { %s941_s8 = scalar_lea.hbm %s1141_s6, 256 }
 0x447   :  { %p942_p9 = scmp.ne.s32.totalorder %s1141_s6, %s941_s8  ;;  %p945_p10 = scmp.lt.u32.totalorder %s941_s8, %s1141_s6 }
 0x449   :  { %p947_p11 = pnand %p945_p10, %p942_p9 }
 0x44b   :  { %950 = shalt.err (!%p947_p11)
}
 0x44c   :  { %628 = dma.vmem_to_hbm [thread:$0]  %s623_s29, 256, %s1141_s6, [#allocation4], %s963_s1, %s963_s1, %s964_s21  }
 0x44d   :  { %957 = dma.done.wait [#allocation4], 256  }
 0x44e   :  { %958 = vsyncadd [#allocation4], 4294967040 }
 0x44f   :  { %632 = vsyncpa [#allocation3], 1 }
 0x450   :  { %633 = vsyncpa [#allocation6], 1 }
 0x451   :  { %634 = vsyncpa [#allocation9], 1 }
 0x452   :  { %635 = vsyncpa [#allocation4], 1 }

</bundles_post_ra>
